<compile_context>
chip_gen: v5e
topology: v5e:2x2
jax: 0.10.0
libtpu: 0.0.40
codegen_flags: <defaults>
</compile_context>

<pallas_src>
import functools

import numpy as np
import jax
import jax.numpy as jnp
from jax.experimental import pallas as pl
from jax.experimental.pallas import tpu as pltpu

LANE = 128


def _round_up(x, m):
    return ((x + m - 1) // m) * m


def _conv_out_dim(in_size, kernel_size, stride, padding, dilation):
    return (in_size + 2 * padding - dilation * (kernel_size - 1) - 1) // stride + 1


def _build_toeplitz(w_hwio, in_w, out_w, stride, padding, dilation,
                    in_cols_pad, out_cols_pad, dtype):
    """(KH,KW,Cin,Cout) weights -> merged (KH*in_cols_pad, out_cols_pad) matrix.

    For row-window kh:
      T[kh*in_cols_pad + wi*Cin + ci, ow*Cout + co] =
          sum_{kw : ow*stride + kw*dilation - padding == wi} w[kh, kw, ci, co]
    Out-of-range wi are dropped, so the W zero-padding is folded in.  Both the
    input-column and output-column axes are zero-padded to a multiple of 128
    so every in-kernel load/store is lane-dense.
    """
    kh_sz, kw_sz, cin, cout = w_hwio.shape
    w_np = np.asarray(w_hwio, dtype=np.float32)
    t = np.zeros((kh_sz, in_cols_pad, out_cols_pad), np.float32)
    for ow in range(out_w):
        for kw in range(kw_sz):
            wi = ow * stride + kw * dilation - padding
            if 0 <= wi < in_w:
                t[:, wi * cin:(wi + 1) * cin, ow * cout:(ow + 1) * cout] += \
                    w_np[:, kw, :, :]
    return jnp.asarray(t.reshape(kh_sz * in_cols_pad, out_cols_pad), dtype=dtype)


def _fused_cnn_kernel(*refs, metas, block_b):
    """One grid step = BLOCK_B images run through every Conv+ReLU layer.

    refs = (x_ref,                                   # (B, Hp0, 128)
            t_ref[0], b_ref[0], ..., t_ref[L-1], b_ref[L-1],
            o_ref,                                   # (B, OH_L, 128)
            scratch[0], ..., scratch[L-2])           # (B, OH_l + 2*pad_{l+1}, 128)
    """
    n_layers = len(metas)
    x_ref = refs[0]
    o_ref = refs[1 + 2 * n_layers]
    scratch = refs[2 + 2 * n_layers:]

    # Zero only the H-padding border rows of the intermediates (the interior
    # rows and all 128 lanes are fully overwritten below).  Done every step:
    # with a "parallel" grid each TensorCore has its own scratch and may never
    # run step 0, so a one-time pl.when(program_id == 0) init would be unsafe.
    for l in range(n_layers - 1):
        p = metas[l + 1]["padding"]
        if p > 0:
            s_ref = scratch[l]
            rows = s_ref.shape[1]
            zeros = jnp.zeros((block_b, p, s_ref.shape[2]), s_ref.dtype)
            s_ref[:, :p, :] = zeros
            s_ref[:, rows - p:, :] = zeros

    def window(ref, img, kh, meta):
        start = kh * meta["dilation"]
        if meta["stride"] == 1:
            return ref[img, pl.ds(start, meta["oh"]), :]
        # TODO(synk): stride > 1 path (strided sublane read) is not exercised
        # by the __main__ config; validate against reference() before relying
        # on it.
        return ref[img, pl.ds(start, meta["oh"], meta["stride"]), :]

    src_ref = x_ref
    for l, meta in enumerate(metas):
        t = refs[1 + 2 * l][...]          # (KH*128, 128) bf16 merged Toeplitz
        bias = refs[2 + 2 * l][...]       # (1, 128) f32
        for img in range(block_b):
            parts = [window(src_ref, img, kh, meta) for kh in range(meta["kh"])]
            lhs = parts[0] if len(parts) == 1 else jnp.concatenate(parts, axis=-1)
            acc = jnp.dot(lhs, t, preferred_element_type=jnp.float32)
            y = jnp.maximum(acc + bias, 0.0)              # f32 bias + ReLU
            if l + 1 < n_layers:
                p_next = metas[l + 1]["padding"]
                scratch[l][img, pl.ds(p_next, meta["oh"]), :] = \
                    y.astype(scratch[l].dtype)            # H-pad rows stay 0
            else:
                o_ref[img, :, :] = y.astype(o_ref.dtype)  # lane-dense store
        if l + 1 < n_layers:
            src_ref = scratch[l]


class CNNModelPallas:
    """Mirrors CNNModel.__init__ layer construction (extra trailing layer)."""

    def __init__(self, n_channels, strides, paddings, kernel_size, dilations,
                 key, input_hw=9, compute_dtype=jnp.bfloat16):
        n_channels = list(n_channels) + [n_channels[-1]]
        paddings = list(paddings) + [paddings[-1]]
        strides = list(strides) + [strides[-1]]
        dilations = list(dilations) + [dilations[-1]]
        ks = kernel_size if isinstance(kernel_size, int) else kernel_size[0]
        self.compute_dtype = compute_dtype

        self.params = []       # (HWIO weight, bias) -- used by reference()
        self.layer_cfgs = []
        self.metas = []        # static per-layer geometry for the kernel
        self.toeplitz = []     # (KH*in_cols_pad, out_cols_pad) merged weights
        self.bias_rows = []    # (1, out_cols_pad) f32

        h = w = input_hw
        for idx, (cin, stride, padding, dilation) in enumerate(
                zip(n_channels[:-1], strides, paddings, dilations)):
            cout = n_channels[idx + 1]
            key, wk, bk = jax.random.split(key, 3)
            fan_in = cin * ks * ks
            bound = 1.0 / float(np.sqrt(fan_in))
            w_hwio = jax.random.uniform(wk, (ks, ks, cin, cout),
                                        minval=-bound, maxval=bound,
                                        dtype=jnp.float32)
            b = jax.random.uniform(bk, (cout,), minval=-bound, maxval=bound,
                                   dtype=jnp.float32)
            self.params.append((w_hwio, b))
            self.layer_cfgs.append(dict(stride=stride, padding=padding,
                                        dilation=dilation))

            oh = _conv_out_dim(h, ks, stride, padding, dilation)
            ow = _conv_out_dim(w, ks, stride, padding, dilation)
            in_cols_pad = _round_up(w * cin, LANE)
            out_cols_pad = _round_up(ow * cout, LANE)
            self.toeplitz.append(
                _build_toeplitz(w_hwio, w, ow, stride, padding, dilation,
                                in_cols_pad, out_cols_pad, compute_dtype))
            brow = np.zeros((1, out_cols_pad), np.float32)
            brow[0, :ow * cout] = np.tile(np.asarray(b, np.float32), ow)
            self.bias_rows.append(jnp.asarray(brow))
            self.metas.append(dict(kh=ks, oh=oh, ow=ow, cin=cin, cout=cout,
                                   in_h=h, in_w=w, stride=stride,
                                   padding=padding, dilation=dilation,
                                   in_cols_pad=in_cols_pad,
                                   out_cols_pad=out_cols_pad))
            h, w = oh, ow

    @staticmethod
    def _choose_block_b(n, oh):
        block = max(1, LANE // max(1, oh))     # keep BLOCK_B*OH around <= 128
        if n >= 2:
            block = min(block, n // 2)         # >= 2 grid steps for v7x's 2 TCs
        block = max(1, min(block, n))
        while n % block:                       # block must divide the batch
            block -= 1
        return block

    def __call__(self, x_nchw):
        metas = self.metas
        n = x_nchw.shape[0]
        m0, m_last = metas[0], metas[-1]
        p0 = m0["padding"]
        hp0 = m0["in_h"] + 2 * p0
        in_cols = m0["in_w"] * m0["cin"]
        in_cols_pad = m0["in_cols_pad"]
        out_rows = m_last["oh"]
        out_cols_pad = m_last["out_cols_pad"]
        block_b = self._choose_block_b(n, m0["oh"])
        grid = (n // block_b,)

        # NCHW -> NHWC, pad H only (W padding lives inside the Toeplitz
        # weights), flatten (W, C) onto the lane axis, zero-pad lanes to 128,
        # and cast matmul operands to bf16.  Boundary-only glue.
        x = jnp.transpose(x_nchw, (0, 2, 3, 1)).astype(jnp.float32)
        x = jnp.pad(x, ((0, 0), (p0, p0), (0, 0), (0, 0)))
        x = x.reshape(n, hp0, in_cols)
        x = jnp.pad(x, ((0, 0), (0, 0), (0, in_cols_pad - in_cols)))
        x = x.astype(self.compute_dtype)

        in_specs = [pl.BlockSpec((block_b, hp0, in_cols_pad),
                                 lambda i: (i, 0, 0))]
        operands = [x]
        for t, brow in zip(self.toeplitz, self.bias_rows):
            # Grid-invariant operands; could be pl.Buffered(1) to halve their
            # VMEM reservation (left default for compatibility, ~200 KB here).
            in_specs.append(pl.BlockSpec(t.shape, lambda i: (0, 0)))
            in_specs.append(pl.BlockSpec(brow.shape, lambda i: (0, 0)))
            operands.extend([t, brow])

        scratch_shapes = []
        for l in range(len(metas) - 1):
            rows = metas[l]["oh"] + 2 * metas[l + 1]["padding"]
            scratch_shapes.append(
                pltpu.VMEM((block_b, rows, metas[l]["out_cols_pad"]),
                           self.compute_dtype))

        kernel = functools.partial(_fused_cnn_kernel, metas=metas,
                                   block_b=block_b)
        out3d = pl.pallas_call(
            kernel,
            out_shape=jax.ShapeDtypeStruct((n, out_rows, out_cols_pad),
                                           jnp.float32),
            grid_spec=pltpu.PrefetchScalarGridSpec(
                num_scalar_prefetch=0,
                grid=grid,
                in_specs=in_specs,
                out_specs=pl.BlockSpec((block_b, out_rows, out_cols_pad),
                                       lambda i: (i, 0, 0)),
                scratch_shapes=scratch_shapes,
            ),
            compiler_params=pltpu.CompilerParams(
                dimension_semantics=("parallel",)),
        )(*operands)

        # Drop lane padding, restore NCHW.
        out = out3d[:, :, :m_last["ow"] * m_last["cout"]]
        out = out.reshape(n, m_last["oh"], m_last["ow"], m_last["cout"])
        return jnp.transpose(out, (0, 3, 1, 2))

    def reference(self, x_nchw):
        """Pure-JAX f32 reference (lax.conv, HIGHEST precision)."""
        x = jnp.transpose(x_nchw, (0, 2, 3, 1)).astype(jnp.float32)
        for (w, b), cfg in zip(self.params, self.layer_cfgs):
            s, p, d = cfg["stride"], cfg["padding"], cfg["dilation"]
            y = jax.lax.conv_general_dilated(
                x, w, window_strides=(s, s), padding=[(p, p), (p, p)],
                rhs_dilation=(d, d),
                dimension_numbers=("NHWC", "HWIO", "NHWC"),
                precision=jax.lax.Precision.HIGHEST)
            x = jnp.maximum(y + b[None, None, None, :], 0.0)
        return jnp.transpose(x, (0, 3, 1, 2))


if __name__ == "__main__":
    # Module config: n_channels=[4, 8] -> Conv(4->8)+ReLU, Conv(8->8)+ReLU
    # kernel 3x3, stride 1, padding 1, dilation 1; input spatial 9x9
    # (matches calculate_cnn_output_dim(input_size=9, ...)).
    n_channels = [4, 8]
    strides = [1]
    paddings = [1]
    dilations = [1]
    kernel_size = 3

    key = jax.random.PRNGKey(0)
    pkey, xkey = jax.random.split(key)

    model = CNNModelPallas(n_channels, strides, paddings, kernel_size,
                           dilations, key=pkey, input_hw=9)

    # Batch 8 -> BLOCK_B = 4 images per grid step, grid = (2,)  (both v7x TCs busy).
    x = jax.random.normal(xkey, (8, 4, 9, 9), dtype=jnp.float32)   # NCHW

    fwd = jax.jit(model.__call__)
    y = jax.block_until_ready(fwd(x))

    y_ref = model.reference(x)
    assert y.shape == y_ref.shape == (8, 8, 9, 9), y.shape
    # bf16 matmul operands / bf16 intermediate (f32 accumulation) vs a
    # HIGHEST-precision f32 reference -> tolerance reflects bf16 quantization.
    assert jnp.allclose(y, y_ref, atol=3e-2, rtol=3e-2), \
        float(jnp.max(jnp.abs(y - y_ref)))
    print("KERNEL_OK")
</pallas_src>

<mosaic_0001>
module attributes {stable_mosaic.version = 11 : i64} {
  func.func @_fused_cnn_kernel(%arg0: i32, %arg1: memref<4x11x128xbf16, #tpu.memory_space<vmem>>, %arg2: memref<384x128xbf16, #tpu.memory_space<vmem>>, %arg3: memref<1x128xf32, #tpu.memory_space<vmem>>, %arg4: memref<384x128xbf16, #tpu.memory_space<vmem>>, %arg5: memref<1x128xf32, #tpu.memory_space<vmem>>, %arg6: memref<4x9x128xf32, #tpu.memory_space<vmem>>, %arg7: memref<4x11x128xbf16, #tpu.memory_space<vmem>>) attributes {dimension_semantics = [#tpu.dimension_semantics<parallel>], iteration_bounds = array<i64: 2>, scalar_prefetch = 0 : i64, scratch_operands = 1 : i64, tpu.core_type = #tpu.core_type<tc>, window_params = [{transform_indices = @transform_0, window_bounds = array<i64: 4, 11, 128>}, {pipeline_mode = #tpu.pipeline_mode<synchronous>, transform_indices = @transform_1, window_bounds = array<i64: 384, 128>}, {pipeline_mode = #tpu.pipeline_mode<synchronous>, transform_indices = @transform_2, window_bounds = array<i64: 1, 128>}, {pipeline_mode = #tpu.pipeline_mode<synchronous>, transform_indices = @transform_3, window_bounds = array<i64: 384, 128>}, {pipeline_mode = #tpu.pipeline_mode<synchronous>, transform_indices = @transform_4, window_bounds = array<i64: 1, 128>}, {transform_indices = @transform_5, window_bounds = array<i64: 4, 9, 128>}]} {
    %cst = arith.constant 0.000000e+00 : bf16
    %0 = vector.broadcast %cst : bf16 to vector<4x1x128xbf16>
    %c0 = arith.constant 0 : index
    %c0_0 = arith.constant 0 : index
    %c0_1 = arith.constant 0 : index
    %1 = vector.load %arg7[%c0, %c0_0, %c0_1] : memref<4x11x128xbf16, #tpu.memory_space<vmem>>, vector<4x1x128xbf16>
    tpu.vector_store %arg7[%c0, %c0_0, %c0_1], %0 {strides = array<i32>} : memref<4x11x128xbf16, #tpu.memory_space<vmem>>, vector<4x1x128xbf16>,
    %c0_2 = arith.constant 0 : index
    %c10 = arith.constant 10 : index
    %c0_3 = arith.constant 0 : index
    %2 = vector.load %arg7[%c0_2, %c10, %c0_3] : memref<4x11x128xbf16, #tpu.memory_space<vmem>>, vector<4x1x128xbf16>
    tpu.vector_store %arg7[%c0_2, %c10, %c0_3], %0 {strides = array<i32>} : memref<4x11x128xbf16, #tpu.memory_space<vmem>>, vector<4x1x128xbf16>,
    %c0_4 = arith.constant 0 : index
    %c0_5 = arith.constant 0 : index
    %3 = vector.load %arg2[%c0_4, %c0_5] : memref<384x128xbf16, #tpu.memory_space<vmem>>, vector<384x128xbf16>
    %c0_6 = arith.constant 0 : index
    %c0_7 = arith.constant 0 : index
    %4 = vector.load %arg3[%c0_6, %c0_7] : memref<1x128xf32, #tpu.memory_space<vmem>>, vector<1x128xf32>
    %c0_8 = arith.constant 0 : index
    %c0_9 = arith.constant 0 : index
    %c0_10 = arith.constant 0 : index
    %5 = vector.load %arg1[%c0_8, %c0_9, %c0_10] : memref<4x11x128xbf16, #tpu.memory_space<vmem>>, vector<1x9x128xbf16>
    %6 = vector.shape_cast %5 : vector<1x9x128xbf16> to vector<9x128xbf16>
    %c0_11 = arith.constant 0 : index
    %c1 = arith.constant 1 : index
    %c0_12 = arith.constant 0 : index
    %7 = vector.load %arg1[%c0_11, %c1, %c0_12] : memref<4x11x128xbf16, #tpu.memory_space<vmem>>, vector<1x9x128xbf16>
    %8 = vector.shape_cast %7 : vector<1x9x128xbf16> to vector<9x128xbf16>
    %c0_13 = arith.constant 0 : index
    %c2 = arith.constant 2 : index
    %c0_14 = arith.constant 0 : index
    %9 = vector.load %arg1[%c0_13, %c2, %c0_14] : memref<4x11x128xbf16, #tpu.memory_space<vmem>>, vector<1x9x128xbf16>
    %10 = vector.shape_cast %9 : vector<1x9x128xbf16> to vector<9x128xbf16>
    %11 = tpu.concatenate %6, %8, %10 in 1 : vector<9x128xbf16>, vector<9x128xbf16>, vector<9x128xbf16> -> vector<9x384xbf16>
    %cst_15 = arith.constant dense<0.000000e+00> : vector<9x128xf32>
    %12 = tpu.matmul %11, %3, %cst_15 {dimension_numbers = #tpu.dot_dimension_numbers<[1], [0], [0], [1], [0, 0, 1, 1], [], []>} : vector<9x384xbf16>, vector<384x128xbf16>, vector<9x128xf32> -> vector<9x128xf32>
    %13 = vector.broadcast %4 : vector<1x128xf32> to vector<9x128xf32>
    %14 = arith.addf %12, %13 : vector<9x128xf32>
    %cst_16 = arith.constant 0.000000e+00 : f32
    %15 = vector.broadcast %cst_16 : f32 to vector<9x128xf32>
    %16 = arith.maximumf %14, %15 : vector<9x128xf32>
    %17 = arith.truncf %16 : vector<9x128xf32> to vector<9x128xbf16>
    %c0_17 = arith.constant 0 : index
    %c1_18 = arith.constant 1 : index
    %c0_19 = arith.constant 0 : index
    %18 = vector.load %arg7[%c0_17, %c1_18, %c0_19] : memref<4x11x128xbf16, #tpu.memory_space<vmem>>, vector<1x9x128xbf16>
    %19 = vector.shape_cast %18 : vector<1x9x128xbf16> to vector<9x128xbf16>
    %20 = vector.shape_cast %17 : vector<9x128xbf16> to vector<1x9x128xbf16>
    tpu.vector_store %arg7[%c0_17, %c1_18, %c0_19], %20 {strides = array<i32>} : memref<4x11x128xbf16, #tpu.memory_space<vmem>>, vector<1x9x128xbf16>,
    %c1_20 = arith.constant 1 : index
    %c0_21 = arith.constant 0 : index
    %c0_22 = arith.constant 0 : index
    %21 = vector.load %arg1[%c1_20, %c0_21, %c0_22] : memref<4x11x128xbf16, #tpu.memory_space<vmem>>, vector<1x9x128xbf16>
    %22 = vector.shape_cast %21 : vector<1x9x128xbf16> to vector<9x128xbf16>
    %c1_23 = arith.constant 1 : index
    %c1_24 = arith.constant 1 : index
    %c0_25 = arith.constant 0 : index
    %23 = vector.load %arg1[%c1_23, %c1_24, %c0_25] : memref<4x11x128xbf16, #tpu.memory_space<vmem>>, vector<1x9x128xbf16>
    %24 = vector.shape_cast %23 : vector<1x9x128xbf16> to vector<9x128xbf16>
    %c1_26 = arith.constant 1 : index
    %c2_27 = arith.constant 2 : index
    %c0_28 = arith.constant 0 : index
    %25 = vector.load %arg1[%c1_26, %c2_27, %c0_28] : memref<4x11x128xbf16, #tpu.memory_space<vmem>>, vector<1x9x128xbf16>
    %26 = vector.shape_cast %25 : vector<1x9x128xbf16> to vector<9x128xbf16>
    %27 = tpu.concatenate %22, %24, %26 in 1 : vector<9x128xbf16>, vector<9x128xbf16>, vector<9x128xbf16> -> vector<9x384xbf16>
    %cst_29 = arith.constant dense<0.000000e+00> : vector<9x128xf32>
    %28 = tpu.matmul %27, %3, %cst_29 {dimension_numbers = #tpu.dot_dimension_numbers<[1], [0], [0], [1], [0, 0, 1, 1], [], []>} : vector<9x384xbf16>, vector<384x128xbf16>, vector<9x128xf32> -> vector<9x128xf32>
    %29 = vector.broadcast %4 : vector<1x128xf32> to vector<9x128xf32>
    %30 = arith.addf %28, %29 : vector<9x128xf32>
    %cst_30 = arith.constant 0.000000e+00 : f32
    %31 = vector.broadcast %cst_30 : f32 to vector<9x128xf32>
    %32 = arith.maximumf %30, %31 : vector<9x128xf32>
    %33 = arith.truncf %32 : vector<9x128xf32> to vector<9x128xbf16>
    %c1_31 = arith.constant 1 : index
    %c1_32 = arith.constant 1 : index
    %c0_33 = arith.constant 0 : index
    %34 = vector.load %arg7[%c1_31, %c1_32, %c0_33] : memref<4x11x128xbf16, #tpu.memory_space<vmem>>, vector<1x9x128xbf16>
    %35 = vector.shape_cast %34 : vector<1x9x128xbf16> to vector<9x128xbf16>
    %36 = vector.shape_cast %33 : vector<9x128xbf16> to vector<1x9x128xbf16>
    tpu.vector_store %arg7[%c1_31, %c1_32, %c0_33], %36 {strides = array<i32>} : memref<4x11x128xbf16, #tpu.memory_space<vmem>>, vector<1x9x128xbf16>,
    %c2_34 = arith.constant 2 : index
    %c0_35 = arith.constant 0 : index
    %c0_36 = arith.constant 0 : index
    %37 = vector.load %arg1[%c2_34, %c0_35, %c0_36] : memref<4x11x128xbf16, #tpu.memory_space<vmem>>, vector<1x9x128xbf16>
    %38 = vector.shape_cast %37 : vector<1x9x128xbf16> to vector<9x128xbf16>
    %c2_37 = arith.constant 2 : index
    %c1_38 = arith.constant 1 : index
    %c0_39 = arith.constant 0 : index
    %39 = vector.load %arg1[%c2_37, %c1_38, %c0_39] : memref<4x11x128xbf16, #tpu.memory_space<vmem>>, vector<1x9x128xbf16>
    %40 = vector.shape_cast %39 : vector<1x9x128xbf16> to vector<9x128xbf16>
    %c2_40 = arith.constant 2 : index
    %c2_41 = arith.constant 2 : index
    %c0_42 = arith.constant 0 : index
    %41 = vector.load %arg1[%c2_40, %c2_41, %c0_42] : memref<4x11x128xbf16, #tpu.memory_space<vmem>>, vector<1x9x128xbf16>
    %42 = vector.shape_cast %41 : vector<1x9x128xbf16> to vector<9x128xbf16>
    %43 = tpu.concatenate %38, %40, %42 in 1 : vector<9x128xbf16>, vector<9x128xbf16>, vector<9x128xbf16> -> vector<9x384xbf16>
    %cst_43 = arith.constant dense<0.000000e+00> : vector<9x128xf32>
    %44 = tpu.matmul %43, %3, %cst_43 {dimension_numbers = #tpu.dot_dimension_numbers<[1], [0], [0], [1], [0, 0, 1, 1], [], []>} : vector<9x384xbf16>, vector<384x128xbf16>, vector<9x128xf32> -> vector<9x128xf32>
    %45 = vector.broadcast %4 : vector<1x128xf32> to vector<9x128xf32>
    %46 = arith.addf %44, %45 : vector<9x128xf32>
    %cst_44 = arith.constant 0.000000e+00 : f32
    %47 = vector.broadcast %cst_44 : f32 to vector<9x128xf32>
    %48 = arith.maximumf %46, %47 : vector<9x128xf32>
    %49 = arith.truncf %48 : vector<9x128xf32> to vector<9x128xbf16>
    %c2_45 = arith.constant 2 : index
    %c1_46 = arith.constant 1 : index
    %c0_47 = arith.constant 0 : index
    %50 = vector.load %arg7[%c2_45, %c1_46, %c0_47] : memref<4x11x128xbf16, #tpu.memory_space<vmem>>, vector<1x9x128xbf16>
    %51 = vector.shape_cast %50 : vector<1x9x128xbf16> to vector<9x128xbf16>
    %52 = vector.shape_cast %49 : vector<9x128xbf16> to vector<1x9x128xbf16>
    tpu.vector_store %arg7[%c2_45, %c1_46, %c0_47], %52 {strides = array<i32>} : memref<4x11x128xbf16, #tpu.memory_space<vmem>>, vector<1x9x128xbf16>,
    %c3 = arith.constant 3 : index
    %c0_48 = arith.constant 0 : index
    %c0_49 = arith.constant 0 : index
    %53 = vector.load %arg1[%c3, %c0_48, %c0_49] : memref<4x11x128xbf16, #tpu.memory_space<vmem>>, vector<1x9x128xbf16>
    %54 = vector.shape_cast %53 : vector<1x9x128xbf16> to vector<9x128xbf16>
    %c3_50 = arith.constant 3 : index
    %c1_51 = arith.constant 1 : index
    %c0_52 = arith.constant 0 : index
    %55 = vector.load %arg1[%c3_50, %c1_51, %c0_52] : memref<4x11x128xbf16, #tpu.memory_space<vmem>>, vector<1x9x128xbf16>
    %56 = vector.shape_cast %55 : vector<1x9x128xbf16> to vector<9x128xbf16>
    %c3_53 = arith.constant 3 : index
    %c2_54 = arith.constant 2 : index
    %c0_55 = arith.constant 0 : index
    %57 = vector.load %arg1[%c3_53, %c2_54, %c0_55] : memref<4x11x128xbf16, #tpu.memory_space<vmem>>, vector<1x9x128xbf16>
    %58 = vector.shape_cast %57 : vector<1x9x128xbf16> to vector<9x128xbf16>
    %59 = tpu.concatenate %54, %56, %58 in 1 : vector<9x128xbf16>, vector<9x128xbf16>, vector<9x128xbf16> -> vector<9x384xbf16>
    %cst_56 = arith.constant dense<0.000000e+00> : vector<9x128xf32>
    %60 = tpu.matmul %59, %3, %cst_56 {dimension_numbers = #tpu.dot_dimension_numbers<[1], [0], [0], [1], [0, 0, 1, 1], [], []>} : vector<9x384xbf16>, vector<384x128xbf16>, vector<9x128xf32> -> vector<9x128xf32>
    %61 = vector.broadcast %4 : vector<1x128xf32> to vector<9x128xf32>
    %62 = arith.addf %60, %61 : vector<9x128xf32>
    %cst_57 = arith.constant 0.000000e+00 : f32
    %63 = vector.broadcast %cst_57 : f32 to vector<9x128xf32>
    %64 = arith.maximumf %62, %63 : vector<9x128xf32>
    %65 = arith.truncf %64 : vector<9x128xf32> to vector<9x128xbf16>
    %c3_58 = arith.constant 3 : index
    %c1_59 = arith.constant 1 : index
    %c0_60 = arith.constant 0 : index
    %66 = vector.load %arg7[%c3_58, %c1_59, %c0_60] : memref<4x11x128xbf16, #tpu.memory_space<vmem>>, vector<1x9x128xbf16>
    %67 = vector.shape_cast %66 : vector<1x9x128xbf16> to vector<9x128xbf16>
    %68 = vector.shape_cast %65 : vector<9x128xbf16> to vector<1x9x128xbf16>
    tpu.vector_store %arg7[%c3_58, %c1_59, %c0_60], %68 {strides = array<i32>} : memref<4x11x128xbf16, #tpu.memory_space<vmem>>, vector<1x9x128xbf16>,
    %c0_61 = arith.constant 0 : index
    %c0_62 = arith.constant 0 : index
    %69 = vector.load %arg4[%c0_61, %c0_62] : memref<384x128xbf16, #tpu.memory_space<vmem>>, vector<384x128xbf16>
    %c0_63 = arith.constant 0 : index
    %c0_64 = arith.constant 0 : index
    %70 = vector.load %arg5[%c0_63, %c0_64] : memref<1x128xf32, #tpu.memory_space<vmem>>, vector<1x128xf32>
    %c0_65 = arith.constant 0 : index
    %c0_66 = arith.constant 0 : index
    %c0_67 = arith.constant 0 : index
    %71 = vector.load %arg7[%c0_65, %c0_66, %c0_67] : memref<4x11x128xbf16, #tpu.memory_space<vmem>>, vector<1x9x128xbf16>
    %72 = vector.shape_cast %71 : vector<1x9x128xbf16> to vector<9x128xbf16>
    %c0_68 = arith.constant 0 : index
    %c1_69 = arith.constant 1 : index
    %c0_70 = arith.constant 0 : index
    %73 = vector.load %arg7[%c0_68, %c1_69, %c0_70] : memref<4x11x128xbf16, #tpu.memory_space<vmem>>, vector<1x9x128xbf16>
    %74 = vector.shape_cast %73 : vector<1x9x128xbf16> to vector<9x128xbf16>
    %c0_71 = arith.constant 0 : index
    %c2_72 = arith.constant 2 : index
    %c0_73 = arith.constant 0 : index
    %75 = vector.load %arg7[%c0_71, %c2_72, %c0_73] : memref<4x11x128xbf16, #tpu.memory_space<vmem>>, vector<1x9x128xbf16>
    %76 = vector.shape_cast %75 : vector<1x9x128xbf16> to vector<9x128xbf16>
    %77 = tpu.concatenate %72, %74, %76 in 1 : vector<9x128xbf16>, vector<9x128xbf16>, vector<9x128xbf16> -> vector<9x384xbf16>
    %cst_74 = arith.constant dense<0.000000e+00> : vector<9x128xf32>
    %78 = tpu.matmul %77, %69, %cst_74 {dimension_numbers = #tpu.dot_dimension_numbers<[1], [0], [0], [1], [0, 0, 1, 1], [], []>} : vector<9x384xbf16>, vector<384x128xbf16>, vector<9x128xf32> -> vector<9x128xf32>
    %79 = vector.broadcast %70 : vector<1x128xf32> to vector<9x128xf32>
    %80 = arith.addf %78, %79 : vector<9x128xf32>
    %cst_75 = arith.constant 0.000000e+00 : f32
    %81 = vector.broadcast %cst_75 : f32 to vector<9x128xf32>
    %82 = arith.maximumf %80, %81 : vector<9x128xf32>
    %c0_76 = arith.constant 0 : index
    %c0_77 = arith.constant 0 : index
    %c0_78 = arith.constant 0 : index
    %83 = vector.load %arg6[%c0_76, %c0_77, %c0_78] : memref<4x9x128xf32, #tpu.memory_space<vmem>>, vector<1x9x128xf32>
    %84 = vector.shape_cast %83 : vector<1x9x128xf32> to vector<9x128xf32>
    %85 = vector.shape_cast %82 : vector<9x128xf32> to vector<1x9x128xf32>
    tpu.vector_store %arg6[%c0_76, %c0_77, %c0_78], %85 {strides = array<i32>} : memref<4x9x128xf32, #tpu.memory_space<vmem>>, vector<1x9x128xf32>,
    %c1_79 = arith.constant 1 : index
    %c0_80 = arith.constant 0 : index
    %c0_81 = arith.constant 0 : index
    %86 = vector.load %arg7[%c1_79, %c0_80, %c0_81] : memref<4x11x128xbf16, #tpu.memory_space<vmem>>, vector<1x9x128xbf16>
    %87 = vector.shape_cast %86 : vector<1x9x128xbf16> to vector<9x128xbf16>
    %c1_82 = arith.constant 1 : index
    %c1_83 = arith.constant 1 : index
    %c0_84 = arith.constant 0 : index
    %88 = vector.load %arg7[%c1_82, %c1_83, %c0_84] : memref<4x11x128xbf16, #tpu.memory_space<vmem>>, vector<1x9x128xbf16>
    %89 = vector.shape_cast %88 : vector<1x9x128xbf16> to vector<9x128xbf16>
    %c1_85 = arith.constant 1 : index
    %c2_86 = arith.constant 2 : index
    %c0_87 = arith.constant 0 : index
    %90 = vector.load %arg7[%c1_85, %c2_86, %c0_87] : memref<4x11x128xbf16, #tpu.memory_space<vmem>>, vector<1x9x128xbf16>
    %91 = vector.shape_cast %90 : vector<1x9x128xbf16> to vector<9x128xbf16>
    %92 = tpu.concatenate %87, %89, %91 in 1 : vector<9x128xbf16>, vector<9x128xbf16>, vector<9x128xbf16> -> vector<9x384xbf16>
    %cst_88 = arith.constant dense<0.000000e+00> : vector<9x128xf32>
    %93 = tpu.matmul %92, %69, %cst_88 {dimension_numbers = #tpu.dot_dimension_numbers<[1], [0], [0], [1], [0, 0, 1, 1], [], []>} : vector<9x384xbf16>, vector<384x128xbf16>, vector<9x128xf32> -> vector<9x128xf32>
    %94 = vector.broadcast %70 : vector<1x128xf32> to vector<9x128xf32>
    %95 = arith.addf %93, %94 : vector<9x128xf32>
    %cst_89 = arith.constant 0.000000e+00 : f32
    %96 = vector.broadcast %cst_89 : f32 to vector<9x128xf32>
    %97 = arith.maximumf %95, %96 : vector<9x128xf32>
    %c1_90 = arith.constant 1 : index
    %c0_91 = arith.constant 0 : index
    %c0_92 = arith.constant 0 : index
    %98 = vector.load %arg6[%c1_90, %c0_91, %c0_92] : memref<4x9x128xf32, #tpu.memory_space<vmem>>, vector<1x9x128xf32>
    %99 = vector.shape_cast %98 : vector<1x9x128xf32> to vector<9x128xf32>
    %100 = vector.shape_cast %97 : vector<9x128xf32> to vector<1x9x128xf32>
    tpu.vector_store %arg6[%c1_90, %c0_91, %c0_92], %100 {strides = array<i32>} : memref<4x9x128xf32, #tpu.memory_space<vmem>>, vector<1x9x128xf32>,
    %c2_93 = arith.constant 2 : index
    %c0_94 = arith.constant 0 : index
    %c0_95 = arith.constant 0 : index
    %101 = vector.load %arg7[%c2_93, %c0_94, %c0_95] : memref<4x11x128xbf16, #tpu.memory_space<vmem>>, vector<1x9x128xbf16>
    %102 = vector.shape_cast %101 : vector<1x9x128xbf16> to vector<9x128xbf16>
    %c2_96 = arith.constant 2 : index
    %c1_97 = arith.constant 1 : index
    %c0_98 = arith.constant 0 : index
    %103 = vector.load %arg7[%c2_96, %c1_97, %c0_98] : memref<4x11x128xbf16, #tpu.memory_space<vmem>>, vector<1x9x128xbf16>
    %104 = vector.shape_cast %103 : vector<1x9x128xbf16> to vector<9x128xbf16>
    %c2_99 = arith.constant 2 : index
    %c2_100 = arith.constant 2 : index
    %c0_101 = arith.constant 0 : index
    %105 = vector.load %arg7[%c2_99, %c2_100, %c0_101] : memref<4x11x128xbf16, #tpu.memory_space<vmem>>, vector<1x9x128xbf16>
    %106 = vector.shape_cast %105 : vector<1x9x128xbf16> to vector<9x128xbf16>
    %107 = tpu.concatenate %102, %104, %106 in 1 : vector<9x128xbf16>, vector<9x128xbf16>, vector<9x128xbf16> -> vector<9x384xbf16>
    %cst_102 = arith.constant dense<0.000000e+00> : vector<9x128xf32>
    %108 = tpu.matmul %107, %69, %cst_102 {dimension_numbers = #tpu.dot_dimension_numbers<[1], [0], [0], [1], [0, 0, 1, 1], [], []>} : vector<9x384xbf16>, vector<384x128xbf16>, vector<9x128xf32> -> vector<9x128xf32>
    %109 = vector.broadcast %70 : vector<1x128xf32> to vector<9x128xf32>
    %110 = arith.addf %108, %109 : vector<9x128xf32>
    %cst_103 = arith.constant 0.000000e+00 : f32
    %111 = vector.broadcast %cst_103 : f32 to vector<9x128xf32>
    %112 = arith.maximumf %110, %111 : vector<9x128xf32>
    %c2_104 = arith.constant 2 : index
    %c0_105 = arith.constant 0 : index
    %c0_106 = arith.constant 0 : index
    %113 = vector.load %arg6[%c2_104, %c0_105, %c0_106] : memref<4x9x128xf32, #tpu.memory_space<vmem>>, vector<1x9x128xf32>
    %114 = vector.shape_cast %113 : vector<1x9x128xf32> to vector<9x128xf32>
    %115 = vector.shape_cast %112 : vector<9x128xf32> to vector<1x9x128xf32>
    tpu.vector_store %arg6[%c2_104, %c0_105, %c0_106], %115 {strides = array<i32>} : memref<4x9x128xf32, #tpu.memory_space<vmem>>, vector<1x9x128xf32>,
    %c3_107 = arith.constant 3 : index
    %c0_108 = arith.constant 0 : index
    %c0_109 = arith.constant 0 : index
    %116 = vector.load %arg7[%c3_107, %c0_108, %c0_109] : memref<4x11x128xbf16, #tpu.memory_space<vmem>>, vector<1x9x128xbf16>
    %117 = vector.shape_cast %116 : vector<1x9x128xbf16> to vector<9x128xbf16>
    %c3_110 = arith.constant 3 : index
    %c1_111 = arith.constant 1 : index
    %c0_112 = arith.constant 0 : index
    %118 = vector.load %arg7[%c3_110, %c1_111, %c0_112] : memref<4x11x128xbf16, #tpu.memory_space<vmem>>, vector<1x9x128xbf16>
    %119 = vector.shape_cast %118 : vector<1x9x128xbf16> to vector<9x128xbf16>
    %c3_113 = arith.constant 3 : index
    %c2_114 = arith.constant 2 : index
    %c0_115 = arith.constant 0 : index
    %120 = vector.load %arg7[%c3_113, %c2_114, %c0_115] : memref<4x11x128xbf16, #tpu.memory_space<vmem>>, vector<1x9x128xbf16>
    %121 = vector.shape_cast %120 : vector<1x9x128xbf16> to vector<9x128xbf16>
    %122 = tpu.concatenate %117, %119, %121 in 1 : vector<9x128xbf16>, vector<9x128xbf16>, vector<9x128xbf16> -> vector<9x384xbf16>
    %cst_116 = arith.constant dense<0.000000e+00> : vector<9x128xf32>
    %123 = tpu.matmul %122, %69, %cst_116 {dimension_numbers = #tpu.dot_dimension_numbers<[1], [0], [0], [1], [0, 0, 1, 1], [], []>} : vector<9x384xbf16>, vector<384x128xbf16>, vector<9x128xf32> -> vector<9x128xf32>
    %124 = vector.broadcast %70 : vector<1x128xf32> to vector<9x128xf32>
    %125 = arith.addf %123, %124 : vector<9x128xf32>
    %cst_117 = arith.constant 0.000000e+00 : f32
    %126 = vector.broadcast %cst_117 : f32 to vector<9x128xf32>
    %127 = arith.maximumf %125, %126 : vector<9x128xf32>
    %c3_118 = arith.constant 3 : index
    %c0_119 = arith.constant 0 : index
    %c0_120 = arith.constant 0 : index
    %128 = vector.load %arg6[%c3_118, %c0_119, %c0_120] : memref<4x9x128xf32, #tpu.memory_space<vmem>>, vector<1x9x128xf32>
    %129 = vector.shape_cast %128 : vector<1x9x128xf32> to vector<9x128xf32>
    %130 = vector.shape_cast %127 : vector<9x128xf32> to vector<1x9x128xf32>
    tpu.vector_store %arg6[%c3_118, %c0_119, %c0_120], %130 {strides = array<i32>} : memref<4x9x128xf32, #tpu.memory_space<vmem>>, vector<1x9x128xf32>,
    return
  }
  func.func @transform_0(%arg0: i32) -> (i32, i32, i32) {
    %c0_i32 = arith.constant 0 : i32
    %c0_i32_0 = arith.constant 0 : i32
    %c0_i32_1 = arith.constant 0 : i32
    return %arg0, %c0_i32, %c0_i32_0 : i32, i32, i32
  }
  func.func @transform_1(%arg0: i32) -> (i32, i32) {
    %c0_i32 = arith.constant 0 : i32
    %c0_i32_0 = arith.constant 0 : i32
    %c0_i32_1 = arith.constant 0 : i32
    return %c0_i32, %c0_i32_0 : i32, i32
  }
  func.func @transform_2(%arg0: i32) -> (i32, i32) {
    %c0_i32 = arith.constant 0 : i32
    %c0_i32_0 = arith.constant 0 : i32
    %c0_i32_1 = arith.constant 0 : i32
    return %c0_i32, %c0_i32_0 : i32, i32
  }
  func.func @transform_3(%arg0: i32) -> (i32, i32) {
    %c0_i32 = arith.constant 0 : i32
    %c0_i32_0 = arith.constant 0 : i32
    %c0_i32_1 = arith.constant 0 : i32
    return %c0_i32, %c0_i32_0 : i32, i32
  }
  func.func @transform_4(%arg0: i32) -> (i32, i32) {
    %c0_i32 = arith.constant 0 : i32
    %c0_i32_0 = arith.constant 0 : i32
    %c0_i32_1 = arith.constant 0 : i32
    return %c0_i32, %c0_i32_0 : i32, i32
  }
  func.func @transform_5(%arg0: i32) -> (i32, i32, i32) {
    %c0_i32 = arith.constant 0 : i32
    %c0_i32_0 = arith.constant 0 : i32
    %c0_i32_1 = arith.constant 0 : i32
    return %arg0, %c0_i32, %c0_i32_0 : i32, i32, i32
  }
}

</mosaic_0001>

<bundles_post_ra>
// kernel: a_call__.1
= control target key start
LH: loop header
LB: loop body
LE: loop exit
PB: predicated region body
PF: predicated region fallthrough
CT: control target
= control target key end

     0   :  { %s1769_s18 = smov 0   ;;  %s2316_s0 = inlined_call_operand.vmem [shape: bf16[8,11,128], index: 0, kind: input, shape index: {}]   ;;  %s2317_s1 = inlined_call_operand.vmem [shape: bf16[384,128], index: 1, kind: input, shape index: {}]   ;;  %s2318_s2 = inlined_call_operand.vmem [shape: f32[1,128], index: 2, kind: input, shape index: {}]   ;;  %s2319_s3 = inlined_call_operand.vmem [shape: bf16[384,128], index: 3, kind: input, shape index: {}]   ;;  %s2320_s4 = inlined_call_operand.vmem [shape: f32[1,128], index: 4, kind: input, shape index: {}]   ;;  %s2321_s5 = inlined_call_operand.vmem [shape: f32[8,9,128], index: 5, kind: output, shape index: {}]  }
   0x1 LB: > { %s1368_s19 = sadd.s32 4294967295, %s1737_s18   ;;  %p1372_p0 = scmp.ge.s32.totalorder %s1737_s18, 1  ;;  %s1737_s18 = sphi %s1769_s18, %s15_s18  }
   0x2   : > { %p189_p1 = scmp.lt.s32.totalorder %s1737_s18, 3 }
   0x4   : > { %p190_p2 = pnand %p1372_p0, %p189_p1 }
   0x5   : > { %s1373_s26 = sshll.u32 (!%p190_p2), %s1368_s19, 2 }
   0x6   : > { %193 = sbr.rel (%p190_p2) target bundleno = 427 (0x1ab), region = 40  ;;  %p220_p3 = scmp.lt.s32.totalorder (!%p190_p2), %s1373_s26, 7 }
   0xb   : > { %v1780_v0 = vld [vmem:[%s2317_s1 + $0x38] sm:$0xff]  ;;  %v1797_v3 = vld [vmem:[%s2317_s1 + $0x30] sm:$0xff]  ;;  %v1816_v6 = vld [vmem:[%s2317_s1 + $0x28] sm:$0xff]  ;;  %s2331_s26 = smov (!%p220_p3, %s1373_s26), 7  ;;  %vm234_vm0 = vcmask 1040384   ;;  %vm249_vm3 = vcmask 1041409  }
   0xc   : > { %v1785_v1 = vld [vmem:[%s2317_s1 + $0xb8] sm:$0xff]  ;;  %485 = vmatpush.bf16.msra.mxu0 %v1780_v0  ;;  %v1802_v4 = vld [vmem:[%s2317_s1 + $0xb0] sm:$0xff]  ;;  %580 = vmatpush.bf16.msra.mxu3 %v1780_v0  ;;  %v1821_v7 = vld [vmem:[%s2317_s1 + $0xa8] sm:$0xff]  ;;  %s1655_s21 = sshll.u32 %s2331_s26, 3  ;;  %vm235_vm1 = vsmask.f32 256 }
   0xd   : > { %v1790_v2 = vld [vmem:[%s2317_s1 + $0x78] sm:$0xff]  ;;  %513 = vmatpush.bf16.msra.mxu2 %v1785_v1  ;;  %v1809_v5 = vld [vmem:[%s2317_s1 + $0x70] sm:$0xff]  ;;  %v1828_v8 = vld [vmem:[%s2317_s1 + $0x68] sm:$0xff]  ;;  %s1874_s6 = scalar_lea.vmem %s2316_s0, %s1655_s21  ;;  %vm250_vm4 = vsmask.f32 1280  ;;  %vm547_vm6 = vcmask 1043456  }
   0xe   : > { %499 = vmatpush.bf16.msra.mxu1 %v1790_v2  ;;  %v1837_v9 = vld [vmem:[%s2317_s1 + $0x20] sm:$0xff]  ;;  %v1857_v12 = vld [vmem:[%s2317_s1 + $0x18] sm:$0xff]  ;;  %v1879_v15 = vld [vmem:[%s2317_s1 + $0x10] sm:$0xff]  ;;  %vm548_vm7 = vsmask.f32 7938  ;;  %s1656_s8 = sshll.u32 %s2331_s26, 4 }
   0xf   : > { %v1842_v10 = vld [vmem:[%s2317_s1 + $0xa0] sm:$0xff]  ;;  %v1862_v13 = vld [vmem:[%s2317_s1 + $0x98] sm:$0xff]  ;;  %v1886_v16 = vld [vmem:[%s2317_s1 + $0x90] sm:$0xff]  ;;  %vm531_vm9 = vsmask.f32 4368  ;;  %s2303_s11 = scalar_lea.vmem %s2321_s5, %s1656_s8 }
  0x10   : > { %486 = vmatpush.bf16.msra.mxu0 %v1797_v3  ;;  %581 = vmatpush.bf16.msra.mxu3 %v1797_v3  ;;  %v1849_v11 = vld [vmem:[%s2317_s1 + $0x60] sm:$0xff]  ;;  %v1869_v14 = vld [vmem:[%s2317_s1 + $0x58] sm:$0xff]  ;;  %v1895_v19 = vld [vmem:[%s2317_s1 + $0x50] sm:$0xff] }
  0x11   : > { %514 = vmatpush.bf16.msra.mxu2 %v1802_v4  ;;  %v1381_v17 = vld [vmem:[%s1874_s6] sm:$0xf]  ;;  %v1681_v18 = vld [vmem:[%s1874_s6] sm:$0x10]  ;;  %v1900_v20 = vld [vmem:[%s2317_s1 + $0x8] sm:$0xff] }
  0x12   : > { %500 = vmatpush.bf16.msra.mxu1 %v1809_v5  ;;  %v1382_v21 = vor.u32 %v1681_v18, %v1381_v17  ;;  %v1907_v22 = vld [vmem:[%s2317_s1 + $0x88] sm:$0xff]  ;;  %v1385_v23 = vld [vmem:[%s1874_s6] sm:$0xe]  ;;  %v1682_v24 = vld [vmem:[%s1874_s6] sm:$0x30] }
  0x13   : > { %v1916_v25 = vld [vmem:[%s2317_s1 + $0x48] sm:$0xff]  ;;  %v1386_v26 = vor.u32 %v1682_v24, %v1385_v23  ;;  %v1923_v28 = vld [vmem:[%s2317_s1] sm:$0xff]  ;;  %v1501_v38 = vld [vmem:[%s1874_s6 + $0x10] sm:$0xf] }
  0x14   : > { %487 = vmatpush.bf16.msra.mxu0 %v1816_v6  ;;  %582 = vmatpush.bf16.msra.mxu3 %v1816_v6  ;;  %v326_v27 = vshll.u32 %v1382_v21, 16  ;;  %v1928_v29 = vld [vmem:[%s2317_s1 + $0x80] sm:$0xff]  ;;  %v1489_v30 = vld [vmem:[%s1874_s6 + $0x8] sm:$0xf]  ;;  %v1683_v31 = vld [vmem:[%s1874_s6 + $0x8] sm:$0x10] }
  0x15   : > { %515 = vmatpush.bf16.msra.mxu2 %v1821_v7  ;;  %v1937_v32 = vld [vmem:[%s2317_s1 + $0x40] sm:$0xff]  ;;  %v336_v33 = vrot.slane %v1386_v26, 1  ;;  %v324_v34 = vshrl.u32 %v1382_v21, 16  ;;  %v1490_v36 = vor.u32 %v1683_v31, %v1489_v30  ;;  %v1685_v39 = vld [vmem:[%s1874_s6 + $0x10] sm:$0x10]  ;;  %vm2061_vm2 = vmand %vm234_vm0, %vm235_vm1 }
  0x16   : > { %501 = vmatpush.bf16.msra.mxu1 %v1828_v8  ;;  %v328_v35 = vrot.slane %v326_v27, 1  ;;  %v1502_v40 = vor.u32 %v1685_v39, %v1501_v38  ;;  %v1493_v43 = vld [vmem:[%s1874_s6 + $0x8] sm:$0xe]  ;;  %v1684_v44 = vld [vmem:[%s1874_s6 + $0x8] sm:$0x30]  ;;  %v2091_v17 = vld [vmem:[%s2319_s3 + $0x18] sm:$0xff] }
  0x17   : > { %v568_v41 = vshll.u32 %v1490_v36, 16  ;;  %v566_v45 = vshrl.u32 %v1490_v36, 16  ;;  %v1494_v49 = vor.u32 %v1684_v44, %v1493_v43  ;;  %v1513_v53 = vld [vmem:[%s1874_s6 + $0x18] sm:$0xf]  ;;  %v1687_v54 = vld [vmem:[%s1874_s6 + $0x18] sm:$0x10]  ;;  %vm2150_vm5 = vmand %vm249_vm3, %vm250_vm4 }
  0x18   : > { %488 = vmatpush.bf16.msra.mxu0 %v1837_v9  ;;  %583 = vmatpush.bf16.msra.mxu3 %v1837_v9  ;;  %v329_v37 = vor.u32 %v328_v35, %v324_v34  ;;  %v659_v42 = vshll.u32 %v1502_v40, 16  ;;  %v657_v47 = vshrl.u32 %v1502_v40, 16  ;;  %v1514_v55 = vor.u32 %v1687_v54, %v1513_v53  ;;  %v1505_v56 = vld [vmem:[%s1874_s6 + $0x10] sm:$0xe]  ;;  %v1686_v57 = vld [vmem:[%s1874_s6 + $0x10] sm:$0x30]  ;;  %vm2207_vm8 = vmand %vm547_vm6, %vm548_vm7 }
  0x19   : > { %516 = vmatpush.bf16.msra.mxu2 %v1842_v10  ;;  %v570_v46 = vrot.slane %v568_v41, 1  ;;  %v578_v52 = vrot.slane %v1494_v49, 1  ;;  %v1517_v59 = vld [vmem:[%s1874_s6 + $0x18] sm:$0xe]  ;;  %v1688_v60 = vld [vmem:[%s1874_s6 + $0x18] sm:$0x30]  ;;  %v1506_v61 = vor.u32 %v1686_v57, %v1505_v56  ;;  %vm2222_vm10 = vmor %vm235_vm1, %vm531_vm9 }
  0x1a   : > { %502 = vmatpush.bf16.msra.mxu1 %v1849_v11  ;;  %v661_v48 = vrot.slane %v659_v42, 1  ;;  %v750_v58 = vshll.u32 %v1514_v55, 16  ;;  %v748_v62 = vshrl.u32 %v1514_v55, 16  ;;  %v2097_v18 = vld [vmem:[%s2319_s3 + $0x58] sm:$0xff]  ;;  %v2128_v23 = vld [vmem:[%s2319_s3 + $0x8] sm:$0xff]  ;;  %v2145_v26 = vld [vmem:[%s2319_s3] sm:$0xff] }
  0x1b   : > { %v571_v50 = vor.u32 %v570_v46, %v566_v45  ;;  %v2134_v24 = vld [vmem:[%s2319_s3 + $0x48] sm:$0xff]  ;;  %v2163_v30 = vld [vmem:[%s2319_s3 + $0x90] sm:$0xff] }
  0x1c   : > { %489 = vmatpush.bf16.msra.mxu0 %v1857_v12  ;;  %584 = vmatpush.bf16.msra.mxu3 %v1857_v12  ;;  %v662_v51 = vor.u32 %v661_v48, %v657_v47  ;;  %v752_v63 = vrot.slane %v750_v58, 1  ;;  %v255_v58 = vld [vmem:[#allocation2 + $0xc] sm:$0x2] }
  0x1d   : > { %517 = vmatpush.bf16.msra.mxu2 %v1862_v13 }
  0x1e   : > { %503 = vmatpush.bf16.msra.mxu1 %v1869_v14 }
  0x20   : > { %490 = vmatpush.bf16.msra.mxu0 %v1879_v15  ;;  %585 = vmatpush.bf16.msra.mxu3 %v1879_v15 }
  0x21   : > { %518 = vmatpush.bf16.msra.mxu2 %v1886_v16 }
  0x22   : > { %504 = vmatpush.bf16.msra.mxu1 %v1895_v19 }
  0x24   : > { %491 = vmatpush.bf16.msra.mxu0 %v1900_v20  ;;  %586 = vmatpush.bf16.msra.mxu3 %v1900_v20 }
  0x25   : > { %519 = vmatpush.bf16.msra.mxu2 %v1907_v22 }
  0x26   : > { %505 = vmatpush.bf16.msra.mxu1 %v1916_v25 }
  0x28   : > { %492 = vmatpush.bf16.msra.mxu0 %v1923_v28  ;;  %587 = vmatpush.bf16.msra.mxu3 %v1923_v28 }
  0x29   : > { %520 = vmatpush.bf16.msra.mxu2 %v1928_v29 }
  0x2a   : > { %506 = vmatpush.bf16.msra.mxu1 %v1937_v32 }
  0x2b   : > { %493 = vmatmul.bf16.vlgmr.msra.gmra.mxu0 %v1382_v21  ;;  %588 = vmatmul.bf16.vlgmr.msra.gmra.mxu3 %v1490_v36  ;;  %v2116_v21 = vld [vmem:[%s2319_s3 + $0x50] sm:$0xff]  ;;  %v2183_v36 = vld [vmem:[%s2319_s3 + $0x88] sm:$0xff] }
  0x2c   : > { %594 = vmatpush.bf16.msrb.mxu0 %v1790_v2  ;;  %685 = vmatpush.bf16.msrb.mxu3 %v1790_v2 }
  0x2d   : > { %671 = vmatpush.bf16.msrb.mxu2 %v1780_v0  ;;  %507 = vmatmul.bf16.vlgmr.msra.gmra.mxu1 %v329_v37 }
  0x2e   : > { %521 = vmatmul.bf16.vlgmr.msra.gmra.mxu2 %v336_v33  ;;  %608 = vmatpush.bf16.msrb.mxu1 %v1785_v1  ;;  %v240_v33 = vld [vmem:[#allocation2 + $0x8] sm:$0x1] }
  0x2f   : > { %v241_v34 = vsel %vm2061_vm2, 0, %v240_v33 }
  0x30   : > { %595 = vmatpush.bf16.msrb.mxu0 %v1809_v5  ;;  %686 = vmatpush.bf16.msrb.mxu3 %v1809_v5  ;;  %242 = vst [vmem:[#allocation2 + $0x8] sm:$0x1] %v241_v34 }
  0x31   : > { %672 = vmatpush.bf16.msrb.mxu2 %v1797_v3 }
  0x32   : > { %609 = vmatpush.bf16.msrb.mxu1 %v1802_v4 }
  0x34   : > { %596 = vmatpush.bf16.msrb.mxu0 %v1828_v8  ;;  %687 = vmatpush.bf16.msrb.mxu3 %v1828_v8 }
  0x35   : > { %673 = vmatpush.bf16.msrb.mxu2 %v1816_v6 }
  0x36   : > { %610 = vmatpush.bf16.msrb.mxu1 %v1821_v7 }
  0x38   : > { %597 = vmatpush.bf16.msrb.mxu0 %v1849_v11  ;;  %688 = vmatpush.bf16.msrb.mxu3 %v1849_v11 }
  0x39   : > { %674 = vmatpush.bf16.msrb.mxu2 %v1837_v9 }
  0x3a   : > { %611 = vmatpush.bf16.msrb.mxu1 %v1842_v10 }
  0x3c   : > { %598 = vmatpush.bf16.msrb.mxu0 %v1869_v14  ;;  %689 = vmatpush.bf16.msrb.mxu3 %v1869_v14 }
  0x3d   : > { %675 = vmatpush.bf16.msrb.mxu2 %v1857_v12 }
  0x3e   : > { %612 = vmatpush.bf16.msrb.mxu1 %v1862_v13 }
  0x40   : > { %599 = vmatpush.bf16.msrb.mxu0 %v1895_v19  ;;  %690 = vmatpush.bf16.msrb.mxu3 %v1895_v19 }
  0x41   : > { %676 = vmatpush.bf16.msrb.mxu2 %v1879_v15 }
  0x42   : > { %613 = vmatpush.bf16.msrb.mxu1 %v1886_v16 }
  0x44   : > { %600 = vmatpush.bf16.msrb.mxu0 %v1916_v25  ;;  %691 = vmatpush.bf16.msrb.mxu3 %v1916_v25 }
  0x45   : > { %677 = vmatpush.bf16.msrb.mxu2 %v1900_v20 }
  0x46   : > { %614 = vmatpush.bf16.msrb.mxu1 %v1907_v22 }
  0x48   : > { %601 = vmatpush.bf16.msrb.mxu0 %v1937_v32  ;;  %692 = vmatpush.bf16.msrb.mxu3 %v1937_v32 }
  0x49   : > { %678 = vmatpush.bf16.msrb.mxu2 %v1923_v28 }
  0x4a   : > { %615 = vmatpush.bf16.msrb.mxu1 %v1928_v29 }
  0x4b   : > { %602 = vmatmul.bf16.vlgmr.msrb.gmra.mxu0 %v571_v50  ;;  %693 = vmatmul.bf16.vlgmr.msrb.gmra.mxu3 %v662_v51 }
  0x4c   : > { %699 = vmatpush.bf16.msra.mxu0 %v1785_v1  ;;  %790 = vmatpush.bf16.msra.mxu3 %v1785_v1  ;;  %v2016_v1 = vld [vmem:[%s2319_s3 + $0x38] sm:$0xff] }
  0x4d   : > { %776 = vmatpush.bf16.msra.mxu2 %v1790_v2  ;;  %616 = vmatmul.bf16.vlgmr.msrb.gmra.mxu1 %v578_v52  ;;  %v669_v2 = vrot.slane %v1506_v61, 1 }
  0x4e   : > { %762 = vmatpush.bf16.msra.mxu1 %v1780_v0  ;;  %679 = vmatmul.bf16.vlgmr.msrb.gmra.mxu2 %v1502_v40  ;;  %v1518_v0 = vor.u32 %v1688_v60, %v1517_v59  ;;  %v2193_v40 = vld [vmem:[%s2319_s3 + $0x80] sm:$0xff]  ;;  %v243_v59 = vld [vmem:[#allocation2 + $0x10] sm:$0x1]  ;;  %v256_v60 = vsel %vm2150_vm5, 0, %v255_v58 }
  0x4f   : > { %257 = vst [vmem:[#allocation2 + $0xc] sm:$0x2] %v256_v60  ;;  %v246_v60 = vld [vmem:[#allocation2 + $0x18] sm:$0x1] }
  0x50   : > { %700 = vmatpush.bf16.msra.mxu0 %v1802_v4  ;;  %791 = vmatpush.bf16.msra.mxu3 %v1802_v4  ;;  %v753_v4 = vor.u32 %v752_v63, %v748_v62 }
  0x51   : > { %777 = vmatpush.bf16.msra.mxu2 %v1809_v5  ;;  %v760_v5 = vrot.slane %v1518_v0, 1  ;;  %v244_v0 = vsel %vm2061_vm2, 0, %v243_v59 }
  0x52   : > { %763 = vmatpush.bf16.msra.mxu1 %v1797_v3  ;;  %v2021_v3 = vld [vmem:[%s2319_s3 + $0x78] sm:$0xff]  ;;  %245 = vst [vmem:[#allocation2 + $0x10] sm:$0x1] %v244_v0  ;;  %v258_v0 = vld [vmem:[#allocation2 + $0x14] sm:$0x2] }
  0x54   : > { %701 = vmatpush.bf16.msra.mxu0 %v1821_v7  ;;  %792 = vmatpush.bf16.msra.mxu3 %v1821_v7  ;;  %v2037_v7 = vld [vmem:[%s2319_s3 + $0x70] sm:$0xff] }
  0x55   : > { %778 = vmatpush.bf16.msra.mxu2 %v1828_v8  ;;  %v2046_v8 = vld [vmem:[%s2319_s3 + $0x28] sm:$0xff] }
  0x56   : > { %764 = vmatpush.bf16.msra.mxu1 %v1816_v6  ;;  %v2031_v6 = vld [vmem:[%s2319_s3 + $0x30] sm:$0xff] }
  0x58   : > { %702 = vmatpush.bf16.msra.mxu0 %v1842_v10  ;;  %793 = vmatpush.bf16.msra.mxu3 %v1842_v10  ;;  %v2058_v10 = vld [vmem:[%s2319_s3 + $0xb8] sm:$0xff] }
  0x59   : > { %779 = vmatpush.bf16.msra.mxu2 %v1849_v11 }
  0x5a   : > { %765 = vmatpush.bf16.msra.mxu1 %v1837_v9  ;;  %v2053_v9 = vld [vmem:[%s2319_s3 + $0x68] sm:$0xff] }
  0x5c   : > { %703 = vmatpush.bf16.msra.mxu0 %v1862_v13  ;;  %794 = vmatpush.bf16.msra.mxu3 %v1862_v13 }
  0x5d   : > { %780 = vmatpush.bf16.msra.mxu2 %v1869_v14  ;;  %v2072_v14 = vld [vmem:[%s2319_s3 + $0x20] sm:$0xff] }
  0x5e   : > { %766 = vmatpush.bf16.msra.mxu1 %v1857_v12  ;;  %v237_v12 = vld [vmem:[#allocation2] sm:$0x1] }
  0x5f   : > { %v238_v13 = vsel %vm2061_vm2, 0, %v237_v12 }
  0x60   : > { %704 = vmatpush.bf16.msra.mxu0 %v1886_v16  ;;  %795 = vmatpush.bf16.msra.mxu3 %v1886_v16  ;;  %239 = vst [vmem:[#allocation2] sm:$0x1] %v238_v13  ;;  %v2083_v16 = vld [vmem:[%s2319_s3 + $0xb0] sm:$0xff] }
  0x61   : > { %781 = vmatpush.bf16.msra.mxu2 %v1895_v19  ;;  %v2103_v19 = vld [vmem:[%s2319_s3 + $0xa8] sm:$0xff] }
  0x62   : > { %767 = vmatpush.bf16.msra.mxu1 %v1879_v15  ;;  %v2078_v15 = vld [vmem:[%s2319_s3 + $0x60] sm:$0xff] }
  0x64   : > { %705 = vmatpush.bf16.msra.mxu0 %v1907_v22  ;;  %796 = vmatpush.bf16.msra.mxu3 %v1907_v22  ;;  %v2121_v22 = vld [vmem:[%s2319_s3 + $0xa0] sm:$0xff] }
  0x65   : > { %782 = vmatpush.bf16.msra.mxu2 %v1916_v25  ;;  %v2139_v25 = vld [vmem:[%s2319_s3 + $0x98] sm:$0xff] }
  0x66   : > { %768 = vmatpush.bf16.msra.mxu1 %v1900_v20  ;;  %v2109_v20 = vld [vmem:[%s2319_s3 + $0x10] sm:$0xff] }
  0x68   : > { %706 = vmatpush.bf16.msra.mxu0 %v1928_v29  ;;  %797 = vmatpush.bf16.msra.mxu3 %v1928_v29  ;;  %v2158_v29 = vld [vmem:[%s2319_s3 + $0x40] sm:$0xff] }
  0x69   : > { %783 = vmatpush.bf16.msra.mxu2 %v1937_v32  ;;  %v2171_v32 = vld [vmem:[%s2318_s2] ss:$0 sm:$0xff] }
  0x6a   : > { %769 = vmatpush.bf16.msra.mxu1 %v1923_v28  ;;  %v252_v28 = vld [vmem:[#allocation2 + $0x4] sm:$0x2] }
  0x6b   : > { %707 = vmatmul.bf16.vlgmr.msra.gmra.mxu0 %v669_v2  ;;  %798 = vmatmul.bf16.vlgmr.msra.gmra.mxu3 %v760_v5  ;;  %v253_v31 = vsel %vm2150_vm5, 0, %v252_v28 }
  0x6c   : > { %1048 = vmatpush.bf16.msrb.mxu0 %v2016_v1  ;;  %784 = vmatmul.bf16.vlgmr.msra.gmra.mxu2 %v753_v4  ;;  %254 = vst [vmem:[#allocation2 + $0x4] sm:$0x2] %v253_v31 }
  0x6d   : > { %770 = vmatmul.bf16.vlgmr.msra.gmra.mxu1 %v1514_v55  ;;  %1119 = vmatpush.bf16.msrb.mxu3 %v2016_v1  ;;  %v550_v55 = vld [vmem:[#allocation2] sm:$0xf] }
  0x6e   : > { %1062 = vmatpush.bf16.msrb.mxu1 %v2021_v3  ;;  %1076 = vmatpush.bf16.msrb.mxu2 %v2058_v10 }
  0x70   : > { %1049 = vmatpush.bf16.msrb.mxu0 %v2031_v6 }
  0x71   : > { %1120 = vmatpush.bf16.msrb.mxu3 %v2031_v6 }
  0x72   : > { %1063 = vmatpush.bf16.msrb.mxu1 %v2037_v7  ;;  %1077 = vmatpush.bf16.msrb.mxu2 %v2083_v16 }
  0x74   : > { %1050 = vmatpush.bf16.msrb.mxu0 %v2046_v8 }
  0x75   : > { %1121 = vmatpush.bf16.msrb.mxu3 %v2046_v8 }
  0x76   : > { %1064 = vmatpush.bf16.msrb.mxu1 %v2053_v9  ;;  %1078 = vmatpush.bf16.msrb.mxu2 %v2103_v19 }
  0x78   : > { %1051 = vmatpush.bf16.msrb.mxu0 %v2072_v14 }
  0x79   : > { %1122 = vmatpush.bf16.msrb.mxu3 %v2072_v14 }
  0x7a   : > { %1065 = vmatpush.bf16.msrb.mxu1 %v2078_v15  ;;  %1079 = vmatpush.bf16.msrb.mxu2 %v2121_v22 }
  0x7c   : > { %1052 = vmatpush.bf16.msrb.mxu0 %v2091_v17 }
  0x7d   : > { %1123 = vmatpush.bf16.msrb.mxu3 %v2091_v17 }
  0x7e   : > { %1066 = vmatpush.bf16.msrb.mxu1 %v2097_v18  ;;  %1080 = vmatpush.bf16.msrb.mxu2 %v2139_v25 }
  0x80   : > { %1053 = vmatpush.bf16.msrb.mxu0 %v2109_v20 }
  0x81   : > { %1124 = vmatpush.bf16.msrb.mxu3 %v2109_v20 }
  0x82   : > { %1067 = vmatpush.bf16.msrb.mxu1 %v2116_v21  ;;  %1081 = vmatpush.bf16.msrb.mxu2 %v2163_v30 }
  0x84   : > { %1054 = vmatpush.bf16.msrb.mxu0 %v2128_v23 }
  0x85   : > { %1125 = vmatpush.bf16.msrb.mxu3 %v2128_v23 }
  0x86   : > { %1068 = vmatpush.bf16.msrb.mxu1 %v2134_v24  ;;  %1082 = vmatpush.bf16.msrb.mxu2 %v2183_v36 }
  0x88   : > { %1055 = vmatpush.bf16.msrb.mxu0 %v2145_v26 }
  0x89   : > { %1126 = vmatpush.bf16.msrb.mxu3 %v2145_v26 }
  0x8a   : > { %1069 = vmatpush.bf16.msrb.mxu1 %v2158_v29  ;;  %1083 = vmatpush.bf16.msrb.mxu2 %v2193_v40 }
  0x8c   : > { %1133 = vmatpush.bf16.msra.mxu0 %v2021_v3 }
  0x8d   : > { %1205 = vmatpush.bf16.msra.mxu3 %v2021_v3 }
  0x8e   : > { %1147 = vmatpush.bf16.msra.mxu1 %v2058_v10  ;;  %1191 = vmatpush.bf16.msra.mxu2 %v2016_v1 }
  0x90   : > { %1134 = vmatpush.bf16.msra.mxu0 %v2037_v7 }
  0x91   : > { %1206 = vmatpush.bf16.msra.mxu3 %v2037_v7 }
  0x92   : > { %1148 = vmatpush.bf16.msra.mxu1 %v2083_v16  ;;  %1192 = vmatpush.bf16.msra.mxu2 %v2031_v6 }
  0x94   : > { %1135 = vmatpush.bf16.msra.mxu0 %v2053_v9 }
  0x95   : > { %1207 = vmatpush.bf16.msra.mxu3 %v2053_v9 }
  0x96   : > { %1149 = vmatpush.bf16.msra.mxu1 %v2103_v19  ;;  %1193 = vmatpush.bf16.msra.mxu2 %v2046_v8 }
  0x98   : > { %1136 = vmatpush.bf16.msra.mxu0 %v2078_v15 }
  0x99   : > { %1208 = vmatpush.bf16.msra.mxu3 %v2078_v15 }
  0x9a   : > { %1150 = vmatpush.bf16.msra.mxu1 %v2121_v22  ;;  %1194 = vmatpush.bf16.msra.mxu2 %v2072_v14 }
  0x9c   : > { %1137 = vmatpush.bf16.msra.mxu0 %v2097_v18 }
  0x9d   : > { %1209 = vmatpush.bf16.msra.mxu3 %v2097_v18 }
  0x9e   : > { %1151 = vmatpush.bf16.msra.mxu1 %v2139_v25  ;;  %1195 = vmatpush.bf16.msra.mxu2 %v2091_v17 }
  0xa0   : > { %1138 = vmatpush.bf16.msra.mxu0 %v2116_v21 }
  0xa1   : > { %1210 = vmatpush.bf16.msra.mxu3 %v2116_v21 }
  0xa2   : > { %1152 = vmatpush.bf16.msra.mxu1 %v2163_v30  ;;  %1196 = vmatpush.bf16.msra.mxu2 %v2109_v20 }
  0xa4   : > { %1139 = vmatpush.bf16.msra.mxu0 %v2134_v24 }
  0xa5   : > { %1211 = vmatpush.bf16.msra.mxu3 %v2134_v24 }
  0xa6   : > { %1153 = vmatpush.bf16.msra.mxu1 %v2183_v36  ;;  %1197 = vmatpush.bf16.msra.mxu2 %v2128_v23 }
  0xa8   : > { %v494_v35 = vpop.f32.mrf.mxu0  ;;  %1140 = vmatpush.bf16.msra.mxu0 %v2158_v29 }
  0xa9   : > { %v495_v37 = vadd.f32 %v2171_v32, %v494_v35  ;;  %1212 = vmatpush.bf16.msra.mxu3 %v2158_v29 }
  0xaa   : > { %v508_v38 = vpop.f32.mrf.mxu1  ;;  %1154 = vmatpush.bf16.msra.mxu1 %v2193_v40  ;;  %1198 = vmatpush.bf16.msra.mxu2 %v2145_v26 }
  0xab   : > { %v509_v39 = vadd.f32 %v508_v38, %v495_v37 }
  0xae   : > { %v589_v5 = vpop.f32.mrf.mxu3 }
  0xaf   : > { %v590_v13 = vadd.f32 %v2171_v32, %v589_v5 }
  0xb0   : > { %v496_v44 = vpop.f32.mrf.mxu0 }
  0xb1   : > { %v522_v41 = vpop.f32.mrf.mxu2  ;;  %v497_v45 = vadd.f32 %v2171_v32, %v496_v44 }
  0xb2   : > { %v523_v42 = vadd.f32 %v522_v41, %v509_v39  ;;  %v510_v47 = vpop.f32.mrf.mxu1 }
  0xb3   : > { %v511_v50 = vadd.f32 %v510_v47, %v497_v45 }
  0xb4   : > { %v527_v43 = vmax.f32 %v523_v42, 0.0 }
  0xb6   : > { %v529_v46 = vpack.c.bf16 %v527_v43, %v527_v43  ;;  %v591_v39 = vpop.f32.mrf.mxu3 }
  0xb8   : > { %v534_v48 = vshrl.u32 %v529_v46, 16  ;;  %v537_v49 = vshll.u32 %v529_v46, 16 }
  0xb9   : > { %v524_v51 = vpop.f32.mrf.mxu2 }
  0xba   : > { %v536_v52 = vrot.slane %v534_v48, 7  ;;  %v525_v53 = vadd.f32 %v524_v51, %v511_v50  ;;  %v592_v48 = vadd.f32 %v2171_v32, %v591_v39 }
  0xbc   : > { %v539_v56 = vor.u32 %v537_v49, %v536_v52  ;;  %v528_v57 = vmax.f32 %v525_v53, 0.0  ;;  %v540_v61 = vrot.slane %v536_v52, 4 }
  0xbe   : > { %v551_v62 = vsel %vm2207_vm8, %v539_v56, %v550_v55  ;;  %v530_v63 = vpack.c.bf16 %v528_v57, %v528_v57 }
  0xbf   : > { %552 = vst [vmem:[#allocation2] sm:$0xf] %v551_v62  ;;  %v247_v62 = vsel %vm2061_vm2, 0, %v246_v60 }
  0xc0   : > { %v542_v4 = vshll.u32 %v530_v63, 16  ;;  %248 = vst [vmem:[#allocation2 + $0x18] sm:$0x1] %v247_v62 }
  0xc2   : > { %v544_v12 = vsel %vm2222_vm10, %v540_v61, %v542_v4  ;;  %v641_v61 = vld [vmem:[#allocation2 + $0x8] sm:$0xf] }
  0xc3   : > { %553 = vst [vmem:[#allocation2 + $0x4] sm:$0x1] %v544_v12 }
  0xc6   : > { %v1525_v28 = vld [vmem:[#allocation2] sm:$0xe] }
  0xc7   : > { %v1521_v31 = vld [vmem:[#allocation2] sm:$0xf] }
  0xc8   : > { %v603_v33 = vpop.f32.mrf.mxu0 }
  0xc9   : > { %v604_v34 = vadd.f32 %v603_v33, %v590_v13 }
  0xca   : > { %v1714_v35 = vld [vmem:[#allocation2] sm:$0x30]  ;;  %v617_v38 = vpop.f32.mrf.mxu1 }
  0xcb   : > { %v1713_v37 = vld [vmem:[#allocation2] sm:$0x10]  ;;  %v1526_v41 = vor.u32 %v1714_v35, %v1525_v28  ;;  %v618_v43 = vadd.f32 %v617_v38, %v604_v34 }
  0xcc   : > { %v1522_v42 = vor.u32 %v1713_v37, %v1521_v31  ;;  %v261_v31 = vld [vmem:[#allocation2 + $0x1c] sm:$0x2] }
  0xcd   : > { %v899_v44 = vrot.slane %v1526_v41, 1  ;;  %v622_v47 = vmax.f32 %v618_v43, 0.0 }
  0xce   : > { %1056 = vmatmul.bf16.vlgmr.msrb.gmra.mxu0 %v1522_v42  ;;  %v887_v45 = vshrl.u32 %v1522_v42, 16  ;;  %v889_v46 = vshll.u32 %v1522_v42, 16  ;;  %v694_v11 = vpop.f32.mrf.mxu3 }
  0xcf   : > { %1219 = vmatpush.bf16.msrb.mxu0 %v2058_v10  ;;  %1084 = vmatmul.bf16.vlgmr.msrb.gmra.mxu2 %v899_v44  ;;  %v624_v50 = vpack.c.bf16 %v622_v47, %v622_v47 }
  0xd0   : > { %v891_v49 = vrot.slane %v889_v46, 1  ;;  %v605_v51 = vpop.f32.mrf.mxu0  ;;  %1277 = vmatpush.bf16.msrb.mxu2 %v2021_v3 }
  0xd1   : > { %v627_v53 = vshrl.u32 %v624_v50, 16  ;;  %v630_v55 = vshll.u32 %v624_v50, 16  ;;  %v606_v56 = vadd.f32 %v605_v51, %v592_v48  ;;  %v680_v13 = vpop.f32.mrf.mxu2 }
  0xd2   : > { %v892_v52 = vor.u32 %v891_v49, %v887_v45  ;;  %v619_v57 = vpop.f32.mrf.mxu1 }
  0xd3   : > { %1220 = vmatpush.bf16.msrb.mxu0 %v2083_v16  ;;  %v629_v58 = vrot.slane %v627_v53, 7  ;;  %v620_v59 = vadd.f32 %v619_v57, %v606_v56  ;;  %v732_v56 = vld [vmem:[#allocation2 + $0x10] sm:$0xf] }
  0xd4   : > { %1070 = vmatmul.bf16.vlgmr.msrb.gmra.mxu1 %v892_v52  ;;  %1278 = vmatpush.bf16.msrb.mxu2 %v2037_v7 }
  0xd5   : > { %1263 = vmatpush.bf16.msrb.mxu1 %v2016_v1  ;;  %v632_v63 = vor.u32 %v630_v55, %v629_v58  ;;  %v623_v3 = vmax.f32 %v620_v59, 0.0  ;;  %v633_v4 = vrot.slane %v629_v58, 4  ;;  %v259_v1 = vsel %vm2150_vm5, 0, %v258_v0 }
  0xd6   : > { %260 = vst [vmem:[#allocation2 + $0x14] sm:$0x2] %v259_v1  ;;  %v696_v35 = vpop.f32.mrf.mxu3 }
  0xd7   : > { %1221 = vmatpush.bf16.msrb.mxu0 %v2103_v19  ;;  %v642_v5 = vsel %vm2207_vm8, %v632_v63, %v641_v61  ;;  %v625_v12 = vpack.c.bf16 %v623_v3, %v623_v3 }
  0xd8   : > { %643 = vst [vmem:[#allocation2 + $0x8] sm:$0xf] %v642_v5  ;;  %1279 = vmatpush.bf16.msrb.mxu2 %v2053_v9  ;;  %v262_v9 = vsel %vm2150_vm5, 0, %v261_v31 }
  0xd9   : > { %1264 = vmatpush.bf16.msrb.mxu1 %v2031_v6  ;;  %v635_v7 = vshll.u32 %v625_v12, 16  ;;  %v681_v6 = vadd.f32 %v2171_v32, %v680_v13  ;;  %263 = vst [vmem:[#allocation2 + $0x1c] sm:$0x2] %v262_v9  ;;  %v682_v38 = vpop.f32.mrf.mxu2 }
  0xdb   : > { %1222 = vmatpush.bf16.msrb.mxu0 %v2121_v22  ;;  %v637_v28 = vsel %vm2222_vm10, %v633_v4, %v635_v7  ;;  %v823_v7 = vld [vmem:[#allocation2 + $0x18] sm:$0xf] }
  0xdc   : > { %644 = vst [vmem:[#allocation2 + $0xc] sm:$0x1] %v637_v28  ;;  %1280 = vmatpush.bf16.msrb.mxu2 %v2078_v15 }
  0xdd   : > { %1265 = vmatpush.bf16.msrb.mxu1 %v2046_v8  ;;  %v695_v8 = vadd.f32 %v694_v11, %v681_v6 }
  0xdf   : > { %1223 = vmatpush.bf16.msrb.mxu0 %v2139_v25  ;;  %v1625_v33 = vld [vmem:[#allocation2 + $0x8] sm:$0xf] }
  0xe0   : > { %1281 = vmatpush.bf16.msrb.mxu2 %v2097_v18  ;;  %v1629_v34 = vld [vmem:[#allocation2 + $0x8] sm:$0xe] }
  0xe1   : > { %1266 = vmatpush.bf16.msrb.mxu1 %v2072_v14 }
  0xe3   : > { %1224 = vmatpush.bf16.msrb.mxu0 %v2163_v30  ;;  %v1715_v15 = vld [vmem:[#allocation2 + $0x8] sm:$0x10] }
  0xe4   : > { %v1716_v37 = vld [vmem:[#allocation2 + $0x8] sm:$0x30]  ;;  %v1626_v39 = vor.u32 %v1715_v15, %v1625_v33  ;;  %1282 = vmatpush.bf16.msrb.mxu2 %v2116_v21 }
  0xe5   : > { %1267 = vmatpush.bf16.msrb.mxu1 %v2091_v17  ;;  %v1630_v41 = vor.u32 %v1716_v37, %v1629_v34  ;;  %v683_v17 = vadd.f32 %v2171_v32, %v682_v38 }
  0xe6   : > { %1127 = vmatmul.bf16.vlgmr.msrb.gmra.mxu3 %v1626_v39  ;;  %v1105_v42 = vshrl.u32 %v1626_v39, 16  ;;  %v1107_v43 = vshll.u32 %v1626_v39, 16 }
  0xe7   : > { %1225 = vmatpush.bf16.msrb.mxu0 %v2183_v36  ;;  %v1117_v27 = vrot.slane %v1630_v41, 1  ;;  %1291 = vmatpush.bf16.msrb.mxu3 %v2058_v10  ;;  %v697_v10 = vadd.f32 %v696_v35, %v683_v17 }
  0xe8   : > { %v708_v14 = vpop.f32.mrf.mxu0  ;;  %v1109_v46 = vrot.slane %v1107_v43, 1  ;;  %1283 = vmatpush.bf16.msrb.mxu2 %v2134_v24 }
  0xe9   : > { %v709_v18 = vadd.f32 %v708_v14, %v695_v8  ;;  %1268 = vmatpush.bf16.msrb.mxu1 %v2109_v20 }
  0xea   : > { %v771_v44 = vpop.f32.mrf.mxu1  ;;  %1155 = vmatmul.bf16.vlgmr.msra.gmra.mxu1 %v1117_v27  ;;  %v1110_v48 = vor.u32 %v1109_v46, %v1105_v42 }
  0xeb   : > { %v713_v45 = vmax.f32 %v709_v18, 0.0  ;;  %v772_v21 = vadd.f32 %v2171_v32, %v771_v44  ;;  %1226 = vmatpush.bf16.msrb.mxu0 %v2193_v40  ;;  %1292 = vmatpush.bf16.msrb.mxu3 %v2083_v16 }
  0xec   : > { %1141 = vmatmul.bf16.vlgmr.msra.gmra.mxu0 %v1110_v48  ;;  %1284 = vmatpush.bf16.msrb.mxu2 %v2158_v29 }
  0xed   : > { %v715_v47 = vpack.c.bf16 %v713_v45, %v713_v45  ;;  %1269 = vmatpush.bf16.msrb.mxu1 %v2128_v23 }
  0xee   : > { %v799_v50 = vpop.f32.mrf.mxu3 }
  0xef   : > { %v718_v49 = vshrl.u32 %v715_v47, 16  ;;  %v785_v20 = vpop.f32.mrf.mxu2  ;;  %v721_v53 = vshll.u32 %v715_v47, 16  ;;  %1293 = vmatpush.bf16.msrb.mxu3 %v2103_v19 }
  0xf0   : > { %v786_v51 = vadd.f32 %v785_v20, %v772_v21  ;;  %v710_v52 = vpop.f32.mrf.mxu0 }
  0xf1   : > { %v720_v24 = vrot.slane %v718_v49, 7  ;;  %v711_v55 = vadd.f32 %v710_v52, %v697_v10  ;;  %1270 = vmatpush.bf16.msrb.mxu1 %v2145_v26 }
  0xf2   : > { %v800_v57 = vadd.f32 %v799_v50, %v786_v51  ;;  %v773_v58 = vpop.f32.mrf.mxu1 }
  0xf3   : > { %v723_v16 = vor.u32 %v721_v53, %v720_v24  ;;  %v714_v23 = vmax.f32 %v711_v55, 0.0  ;;  %v774_v62 = vadd.f32 %v2171_v32, %v773_v58  ;;  %1294 = vmatpush.bf16.msrb.mxu3 %v2121_v22  ;;  %v724_v63 = vrot.slane %v720_v24, 4 }
  0xf4   : > { %v804_v59 = vmax.f32 %v800_v57, 0.0 }
  0xf5   : > { %v733_v60 = vsel %vm2207_vm8, %v723_v16, %v732_v56  ;;  %v716_v61 = vpack.c.bf16 %v714_v23, %v714_v23 }
  0xf6   : > { %734 = vst [vmem:[#allocation2 + $0x10] sm:$0xf] %v733_v60  ;;  %v806_v29 = vpack.c.bf16 %v804_v59, %v804_v59  ;;  %v801_v12 = vpop.f32.mrf.mxu3 }
  0xf7   : > { %v726_v3 = vshll.u32 %v716_v61, 16  ;;  %v787_v0 = vpop.f32.mrf.mxu2  ;;  %1295 = vmatpush.bf16.msrb.mxu3 %v2139_v25 }
  0xf8   : > { %v809_v19 = vshrl.u32 %v806_v29, 16  ;;  %v812_v4 = vshll.u32 %v806_v29, 16  ;;  %v788_v26 = vadd.f32 %v787_v0, %v774_v62 }
  0xf9   : > { %v728_v5 = vsel %vm2222_vm10, %v724_v63, %v726_v3 }
  0xfa   : > { %v811_v1 = vrot.slane %v809_v19, 7  ;;  %735 = vst [vmem:[#allocation2 + $0x14] sm:$0x1] %v728_v5  ;;  %v802_v11 = vadd.f32 %v801_v12, %v788_v26 }
  0xfb   : > { %1296 = vmatpush.bf16.msrb.mxu3 %v2163_v30 }
  0xfc   : > { %v814_v13 = vor.u32 %v812_v4, %v811_v1  ;;  %v805_v32 = vmax.f32 %v802_v11, 0.0  ;;  %v815_v28 = vrot.slane %v811_v1, 4 }
  0xfd   : > { %v1635_v9 = vld [vmem:[#allocation2 + $0x10] sm:$0xf] }
  0xfe   : > { %v824_v22 = vsel %vm2207_vm8, %v814_v13, %v823_v7  ;;  %v807_v6 = vpack.c.bf16 %v805_v32, %v805_v32  ;;  %v1639_v34 = vld [vmem:[#allocation2 + $0x10] sm:$0xe] }
  0xff   : > { %825 = vst [vmem:[#allocation2 + $0x18] sm:$0xf] %v824_v22  ;;  %1297 = vmatpush.bf16.msrb.mxu3 %v2183_v36 }
 0x100   : > { %v817_v31 = vshll.u32 %v807_v6, 16 }
 0x101   : > { %v1717_v33 = vld [vmem:[#allocation2 + $0x10] sm:$0x10] }
 0x102   : > { %v1718_v8 = vld [vmem:[#allocation2 + $0x10] sm:$0x30]  ;;  %v819_v35 = vsel %vm2222_vm10, %v815_v28, %v817_v31  ;;  %v1636_v25 = vor.u32 %v1717_v33, %v1635_v9 }
 0x103   : > { %v1640_v15 = vor.u32 %v1718_v8, %v1639_v34  ;;  %826 = vst [vmem:[#allocation2 + $0x1c] sm:$0x1] %v819_v35  ;;  %1298 = vmatpush.bf16.msrb.mxu3 %v2193_v40  ;;  %v1730_v40 = vld [vmem:[%s2320_s4] ss:$0 sm:$0xff] }
 0x104   : > { %1199 = vmatmul.bf16.vlgmr.msra.gmra.mxu2 %v1636_v25  ;;  %v1179_v37 = vshll.u32 %v1636_v25, 16  ;;  %v1177_v38 = vshrl.u32 %v1636_v25, 16 }
 0x105   : > { %v1189_v54 = vrot.slane %v1640_v15, 1 }
 0x106   : > { %v1181_v30 = vrot.slane %v1179_v37, 1  ;;  %v1645_v41 = vld [vmem:[#allocation2 + $0x18] sm:$0xf] }
 0x107   : > { %1227 = vmatmul.bf16.vlgmr.msrb.gmra.mxu0 %v1189_v54  ;;  %v1649_v36 = vld [vmem:[#allocation2 + $0x18] sm:$0xe] }
 0x108   : > { %v1182_v39 = vor.u32 %v1181_v30, %v1177_v38 }
 0x10a   : > { %1213 = vmatmul.bf16.vlgmr.msra.gmra.mxu3 %v1182_v39  ;;  %v1719_v14 = vld [vmem:[#allocation2 + $0x18] sm:$0x10] }
 0x10b   : > { %v1646_v18 = vor.u32 %v1719_v14, %v1645_v41  ;;  %v1720_v43 = vld [vmem:[#allocation2 + $0x18] sm:$0x30] }
 0x10c   : > { %v1650_v17 = vor.u32 %v1720_v43, %v1649_v36 }
 0x10d   : > { %1271 = vmatmul.bf16.vlgmr.msrb.gmra.mxu1 %v1646_v18  ;;  %v1251_v2 = vshll.u32 %v1646_v18, 16  ;;  %v1249_v42 = vshrl.u32 %v1646_v18, 16 }
 0x10e   : > { %v1261_v45 = vrot.slane %v1650_v17, 1 }
 0x10f   : > { %v1253_v27 = vrot.slane %v1251_v2, 1 }
 0x111   : > { %v1254_v44 = vor.u32 %v1253_v27, %v1249_v42 }
 0x114   : > { %1285 = vmatmul.bf16.vlgmr.msrb.gmra.mxu2 %v1254_v44 }
 0x11a   : > { %1299 = vmatmul.bf16.vlgmr.msrb.gmra.mxu3 %v1261_v45 }
 0x14b   : > { %v1057_v46 = vpop.f32.mrf.mxu0 }
 0x14c   : > { %v1058_v21 = vadd.f32 %v1730_v40, %v1057_v46 }
 0x151   : > { %v1071_v47 = vpop.f32.mrf.mxu1 }
 0x152   : > { %v1072_v48 = vadd.f32 %v1071_v47, %v1058_v21  ;;  %v1085_v10 = vpop.f32.mrf.mxu2 }
 0x153   : > { %v1059_v49 = vpop.f32.mrf.mxu0 }
 0x154   : > { %v1086_v20 = vadd.f32 %v1085_v10, %v1072_v48  ;;  %v1060_v51 = vadd.f32 %v1730_v40, %v1059_v49 }
 0x156   : > { %v1090_v50 = vmax.f32 %v1086_v20, 0.0 }
 0x158   : > { %1092 = vst [vmem:[%s2303_s11] sm:$0xff] %v1090_v50 }
 0x159   : > { %v1073_v52 = vpop.f32.mrf.mxu1 }
 0x15a   : > { %v1074_v24 = vadd.f32 %v1073_v52, %v1060_v51  ;;  %v1087_v53 = vpop.f32.mrf.mxu2 }
 0x15c   : > { %v1088_v55 = vadd.f32 %v1087_v53, %v1074_v24 }
 0x15e   : > { %v1091_v56 = vmax.f32 %v1088_v55, 0.0 }
 0x160   : > { %1093 = vst [vmem:[%s2303_s11 + $0x8] sm:$0x1] %v1091_v56 }
 0x167   : > { %v1156_v58 = vpop.f32.mrf.mxu1 }
 0x169   : > { %v1128_v57 = vpop.f32.mrf.mxu3  ;;  %v1142_v16 = vpop.f32.mrf.mxu0 }
 0x16a   : > { %v1129_v23 = vadd.f32 %v1730_v40, %v1128_v57 }
 0x16c   : > { %v1143_v59 = vadd.f32 %v1142_v16, %v1129_v23 }
 0x16e   : > { %v1157_v60 = vadd.f32 %v1156_v58, %v1143_v59 }
 0x16f   : > { %v1158_v0 = vpop.f32.mrf.mxu1 }
 0x170   : > { %v1161_v61 = vmax.f32 %v1157_v60, 0.0 }
 0x171   : > { %v1130_v29 = vpop.f32.mrf.mxu3  ;;  %v1144_v63 = vpop.f32.mrf.mxu0 }
 0x172   : > { %1631 = vst [vmem:[%s2303_s11 + $0x10] sm:$0xff] %v1161_v61  ;;  %v1131_v62 = vadd.f32 %v1730_v40, %v1130_v29 }
 0x174   : > { %v1145_v3 = vadd.f32 %v1144_v63, %v1131_v62 }
 0x176   : > { %v1159_v19 = vadd.f32 %v1158_v0, %v1145_v3 }
 0x178   : > { %v1162_v4 = vmax.f32 %v1159_v19, 0.0 }
 0x17a   : > { %1632 = vst [vmem:[%s2303_s11 + $0x18] sm:$0x1] %v1162_v4 }
 0x184   : > { %v1228_v12 = vpop.f32.mrf.mxu0 }
 0x187   : > { %v1200_v26 = vpop.f32.mrf.mxu2 }
 0x188   : > { %v1201_v5 = vadd.f32 %v1730_v40, %v1200_v26 }
 0x18a   : > { %v1272_v22 = vpop.f32.mrf.mxu1 }
 0x18b   : > { %v1273_v8 = vadd.f32 %v1730_v40, %v1272_v22 }
 0x18c   : > { %v1230_v9 = vpop.f32.mrf.mxu0 }
 0x18d   : > { %v1214_v1 = vpop.f32.mrf.mxu3 }
 0x18e   : > { %v1215_v11 = vadd.f32 %v1214_v1, %v1201_v5 }
 0x18f   : > { %v1202_v7 = vpop.f32.mrf.mxu2 }
 0x190   : > { %v1229_v13 = vadd.f32 %v1228_v12, %v1215_v11  ;;  %v1203_v28 = vadd.f32 %v1730_v40, %v1202_v7 }
 0x192   : > { %v1233_v32 = vmax.f32 %v1229_v13, 0.0  ;;  %v1274_v37 = vpop.f32.mrf.mxu1 }
 0x193   : > { %v1275_v39 = vadd.f32 %v1730_v40, %v1274_v37 }
 0x194   : > { %1641 = vst [vmem:[%s2303_s11 + $0x20] sm:$0xff] %v1233_v32 }
 0x195   : > { %v1216_v6 = vpop.f32.mrf.mxu3 }
 0x196   : > { %v1217_v31 = vadd.f32 %v1216_v6, %v1203_v28 }
 0x197   : > { %v1286_v33 = vpop.f32.mrf.mxu2 }
 0x198   : > { %v1231_v34 = vadd.f32 %v1230_v9, %v1217_v31  ;;  %v1287_v25 = vadd.f32 %v1286_v33, %v1273_v8 }
 0x19a   : > { %v1234_v35 = vmax.f32 %v1231_v34, 0.0 }
 0x19c   : > { %1642 = vst [vmem:[%s2303_s11 + $0x28] sm:$0x1] %v1234_v35 }
 0x19d   : > { %v1300_v15 = vpop.f32.mrf.mxu3 }
 0x19e   : > { %v1301_v54 = vadd.f32 %v1300_v15, %v1287_v25 }
 0x19f   : > { %v1288_v30 = vpop.f32.mrf.mxu2 }
 0x1a0   : > { %v1305_v38 = vmax.f32 %v1301_v54, 0.0  ;;  %v1289_v41 = vadd.f32 %v1288_v30, %v1275_v39 }
 0x1a2   : > { %1651 = vst [vmem:[%s2303_s11 + $0x30] sm:$0xff] %v1305_v38 }
 0x1a5   : > { %v1302_v14 = vpop.f32.mrf.mxu3 }
 0x1a6   : > { %v1303_v18 = vadd.f32 %v1302_v14, %v1289_v41 }
 0x1a8   : > { %v1306_v2 = vmax.f32 %v1303_v18, 0.0 }
 0x1aa   : > { %1652 = vst [vmem:[%s2303_s11 + $0x38] sm:$0x1] %v1306_v2 }
 0x1ab PF: > { %s15_s18 = sadd.s32 1, %s1737_s18  }
 0x1ac   : > { %p12_p4 = scmp.ge.s32.totalorder %s15_s18, 4  }
 0x1ae   :  { %14 = sbr.rel (!%p12_p4) target bundleno = 1 (0x1), region = 79 }

</bundles_post_ra>
